<compile_context>
chip_gen: v7x
topology: tpu7x:2x2x1
jax: 0.10.0
libtpu: 0.0.40
codegen_flags: <defaults>
</compile_context>

<pallas_src>
import functools

import jax
import jax.numpy as jnp
from jax.experimental import pallas as pl
from jax.experimental.pallas import tpu as pltpu

EPS = 1e-5

# (oy, ox) offsets of the 9 conv taps, t = (oy+1)*3 + (ox+1) (matches HWIO).
_TAPS = tuple((dy - 1, dx - 1) for dy in range(3) for dx in range(3))


# ---------------- one-time rotate-direction self-calibration -----------------
_ROLL_MATCHES_JNP = None


def _roll_matches_jnp_roll() -> bool:
    """pltpu.roll follows jnp.roll (out[i] = x[i - shift]); the rotation
    direction is the one silent failure mode of the tap construction, so
    calibrate it once with a tiny 8x128 probe kernel and cache the answer."""
    global _ROLL_MATCHES_JNP
    if _ROLL_MATCHES_JNP is None:
        def probe(x_ref, o_ref):
            o_ref[...] = pltpu.roll(x_ref[...], 1, axis=1)

        x = jnp.broadcast_to(jnp.arange(128, dtype=jnp.float32), (8, 128))
        out = pl.pallas_call(
            probe, out_shape=jax.ShapeDtypeStruct((8, 128), jnp.float32))(x)
        _ROLL_MATCHES_JNP = bool(out[0, 0] == 127.0)   # jnp.roll: out[0]=x[-1]
    return _ROLL_MATCHES_JNP


# ------------------------- fused conv+BN+ReLU block --------------------------
def _block_kernel(coords_ref, x_ref, w0_ref, wr_ref, gamma_ref, beta_ref,
                  o_ref, *, h, w, nums, roll_sign):
    # coords_ref: (2, L) int32      lane -> (y, x) image coordinates
    # x_ref:      (Cin0, L) f32     input activation, L = N*H*W on lanes
    # w0_ref:     (9, Cout, Cin0)   layer-0 per-tap matmul matrices
    # wr_ref:     (nr, 9, Cout, Cout) layer 1..nums-1 per-tap matrices
    # gamma/beta: (nums, Cout, 1)   BN affine params
    # o_ref:      (Cout, L) f32     output activation (lane-dense)
    L = x_ref.shape[1]
    inv_l = 1.0 / L
    yy = coords_ref[0:1, :]                       # (1, L) int32
    xx = coords_ref[1:2, :]                       # (1, L) int32

    x = x_ref[...]                                # activation stays on-chip
    for layer in range(nums):                     # unrolled at trace time
        acc = None
        for t, (oy, ox) in enumerate(_TAPS):
            # Tap value: activation shifted by the flattened (n,y,x) offset.
            off = oy * w + ox
            if off == 0:
                tap = x
            else:
                tap = pltpu.roll(x, (roll_sign * off) % L, axis=1)    # XLU
            # Zero lanes whose shifted source falls outside the image (this
            # also neutralises the circular wrap of the roll).
            conds = []
            if oy < 0:
                conds.append(yy >= -oy)
            elif oy > 0:
                conds.append(yy < h - oy)
            if ox < 0:
                conds.append(xx >= -ox)
            elif ox > 0:
                conds.append(xx < w - ox)
            if conds:
                valid = functools.reduce(lambda a, c: a & c, conds)   # (1, L)
                tap = tap * valid.astype(tap.dtype)                   # VPU
            # One accumulating K=Cin matmul per tap (no im2col patch matrix).
            wt = w0_ref[t] if layer == 0 else wr_ref[layer - 1, t]    # (Co,Ci)
            part = jnp.dot(wt, tap.astype(wt.dtype),
                           preferred_element_type=jnp.float32)        # MXU
            acc = part if acc is None else acc + part                 # (Co, L)

        # BatchNorm (training-mode biased batch stats over N*H*W) + ReLU, all
        # in f32.  Centered sum of squares avoids E[x^2]-E[x]^2 cancellation.
        # (Conv bias is intentionally absent: it cancels in acc - mean.)
        mean = jnp.sum(acc, axis=1, keepdims=True) * inv_l            # (Co, 1)
        cent = acc - mean
        var = jnp.sum(cent * cent, axis=1, keepdims=True) * inv_l     # biased
        scale = gamma_ref[layer] * jax.lax.rsqrt(var + EPS)
        y = jnp.maximum(cent * scale + beta_ref[layer], 0.0)          # (Co, L)

        if layer == nums - 1:
            o_ref[...] = y                        # lane-dense unmasked store
        else:
            x = y                                 # stays in vregs / VMEM


def hdtr_d_convblock_forward(x_nchw, params, *, matmul_dtype=jnp.bfloat16):
    """Fused forward pass.  params[i] = (w_hwio, bias, gamma, beta); the conv
    bias is accepted but unused (it cancels under training-mode BatchNorm)."""
    n, cin0, h, w = x_nchw.shape
    cout = params[0][0].shape[3]
    nums = len(params)
    L = n * h * w

    # NCHW -> (C, N*H*W): channels on sublanes, batch*spatial on the lane axis
    # so elementwise math, MXU output and the final store are lane-dense.
    x2d = jnp.transpose(x_nchw, (1, 0, 2, 3)).reshape(cin0, L)
    x2d = x2d.astype(jnp.float32)

    # Tiny (2, L) int32 (y, x) coordinate table; the per-tap validity masks
    # are rebuilt in-kernel from it with cheap VPU compares.
    p = jnp.arange(L, dtype=jnp.int32)
    coords = jnp.stack([(p % (h * w)) // w, p % w], axis=0)

    # Per-tap matmul matrices: (9, Cout, Cin), K index = input channel.
    def to_mats(w_hwio):
        cin = w_hwio.shape[2]
        return jnp.transpose(w_hwio.reshape(9, cin, cout),
                             (0, 2, 1)).astype(matmul_dtype)

    w0 = to_mats(params[0][0])                                    # (9, Co, Ci0)
    if nums > 1:
        wr = jnp.stack([to_mats(prm[0]) for prm in params[1:]])   # (nr,9,Co,Co)
    else:
        wr = jnp.zeros((1, 9, cout, cout), matmul_dtype)          # dummy
    gammas = jnp.stack([prm[2].reshape(cout, 1)
                        for prm in params]).astype(jnp.float32)
    betas = jnp.stack([prm[3].reshape(cout, 1)
                       for prm in params]).astype(jnp.float32)

    roll_sign = -1 if _roll_matches_jnp_roll() else 1
    kernel = functools.partial(_block_kernel, h=h, w=w, nums=nums,
                               roll_sign=roll_sign)
    nr = wr.shape[0]

    out2d = pl.pallas_call(
        kernel,
        out_shape=jax.ShapeDtypeStruct((cout, L), jnp.float32),
        grid=(1,),
        in_specs=[
            pl.BlockSpec((2, L), lambda i: (0, 0)),
            pl.BlockSpec((cin0, L), lambda i: (0, 0)),
            pl.BlockSpec((9, cout, cin0), lambda i: (0, 0, 0)),
            pl.BlockSpec((nr, 9, cout, cout), lambda i: (0, 0, 0, 0)),
            pl.BlockSpec((nums, cout, 1), lambda i: (0, 0, 0)),
            pl.BlockSpec((nums, cout, 1), lambda i: (0, 0, 0)),
        ],
        out_specs=pl.BlockSpec((cout, L), lambda i: (0, 0)),
        compiler_params=pltpu.CompilerParams(
            dimension_semantics=("arbitrary",)),
    )(coords, x2d, w0, wr, gammas, betas)

    # (Cout, N*H*W) -> NCHW  (layout plumbing only).
    return jnp.transpose(out2d.reshape(cout, n, h, w), (1, 0, 2, 3))


# ------------------------------- param setup ---------------------------------
def init_params(key, inplanes, outplanes, nums=3):
    params = []
    cin = inplanes
    for _ in range(nums):
        key, kw, kb, kg, kbt = jax.random.split(key, 5)
        w = 0.1 * jax.random.normal(kw, (3, 3, cin, outplanes), jnp.float32)
        b = 0.1 * jax.random.normal(kb, (outplanes,), jnp.float32)
        gamma = 1.0 + 0.1 * jax.random.normal(kg, (outplanes,), jnp.float32)
        beta = 0.1 * jax.random.normal(kbt, (outplanes,), jnp.float32)
        params.append((w, b, gamma, beta))
        cin = outplanes
    return params


# --------------------------------- reference ---------------------------------
def _reference(x_nchw, params):
    net = jnp.transpose(x_nchw, (0, 2, 3, 1))
    for (w, b, gamma, beta) in params:
        net = jax.lax.conv_general_dilated(
            net, w, window_strides=(1, 1), padding=((1, 1), (1, 1)),
            dimension_numbers=("NHWC", "HWIO", "NHWC"),
            precision=jax.lax.Precision.HIGHEST) + b
        mean = jnp.mean(net, axis=(0, 1, 2))
        var = jnp.var(net, axis=(0, 1, 2))           # biased (training mode)
        net = (net - mean) * jax.lax.rsqrt(var + EPS) * gamma + beta
        net = jnp.maximum(net, 0.0)
    return jnp.transpose(net, (0, 3, 1, 2))


if __name__ == "__main__":
    key = jax.random.PRNGKey(0)
    kx, kp = jax.random.split(key)

    N, Cin, Cout, H, W = 2, 4, 8, 16, 16
    x = jax.random.normal(kx, (N, Cin, H, W), jnp.float32)   # NCHW like PyTorch
    params = init_params(kp, Cin, Cout, nums=3)

    ref = _reference(x, params)

    # f32-operand path: checks fused conv/BN/ReLU semantics.  Tolerance covers
    # worst-case MXU pass precision for f32 operands; post-BN values are O(1).
    out_f32 = jax.block_until_ready(
        hdtr_d_convblock_forward(x, params, matmul_dtype=jnp.float32))
    assert out_f32.shape == (N, Cout, H, W)
    assert jnp.allclose(out_f32, ref, rtol=3e-2, atol=3e-2), \
        "f32 path mismatch vs reference"

    # bf16 MXU-operand path (production config per perf review): BN statistics
    # and elementwise math stay f32; tolerance sized for bf16 quantization of
    # three stacked conv layers after BN renormalization.
    out_bf16 = jax.block_until_ready(hdtr_d_convblock_forward(x, params))
    assert out_bf16.shape == (N, Cout, H, W)
    assert jnp.allclose(out_bf16, ref, rtol=7e-2, atol=7e-2), \
        "bf16 path mismatch vs reference"

    print("KERNEL_OK")
</pallas_src>

<mosaic_0001>
module attributes {stable_mosaic.version = 11 : i64} {
  func.func @probe(%arg0: memref<8x128xf32, #tpu.memory_space<vmem>>, %arg1: memref<8x128xf32, #tpu.memory_space<vmem>>) attributes {dimension_semantics = [], scalar_prefetch = 0 : i64, scratch_operands = 0 : i64, tpu.core_type = #tpu.core_type<tc>} {
    %c0 = arith.constant 0 : index
    %c0_0 = arith.constant 0 : index
    %0 = vector.load %arg0[%c0, %c0_0] : memref<8x128xf32, #tpu.memory_space<vmem>>, vector<8x128xf32>
    %c1_i32 = arith.constant 1 : i32
    %1 = tpu.dynamic_rotate %0 by %c1_i32 dim 1 : vector<8x128xf32>, i32 -> vector<8x128xf32>
    %c0_1 = arith.constant 0 : index
    %c0_2 = arith.constant 0 : index
    %2 = vector.load %arg1[%c0_1, %c0_2] : memref<8x128xf32, #tpu.memory_space<vmem>>, vector<8x128xf32>
    tpu.vector_store %arg1[%c0_1, %c0_2], %1 {strides = array<i32>} : memref<8x128xf32, #tpu.memory_space<vmem>>, vector<8x128xf32>,
    return
  }
}

</mosaic_0001>

<bundles_post_ra>
// kernel: tpu_custom_call.1
= control target key start
LH: loop header
LB: loop body
LE: loop exit
PB: predicated region body
PF: predicated region fallthrough
CT: control target
= control target key end

     0   :  { %6 = vsyncpa [#allocation3], 0  ;;  %s128_s0 = inlined_call_operand.hbm [shape: f32[8,128], index: 0, kind: input, shape index: {}]   ;;  %s129_s1 = inlined_call_operand.hbm [shape: f32[8,128], index: 1, kind: output, shape index: {}]  }
   0x1   :  { %7 = vsyncpa [#allocation4], 0  ;;  %s91_s6 = smov [#allocation2]   ;;  %s43_s10 = scalar_lea.hbm %s128_s0, 128 }
   0x2   :  { %s14_s7 = sshll.u32 %s91_s6, 4  ;;  %p44_p0 = scmp.ne.s32.totalorder %s128_s0, %s43_s10  ;;  %s15_s7 = int_to_ptr.vmem [resolvable:$true] %s14_s7 }
   0x3   :  { %p47_p1 = scmp.lt.u32.totalorder %s43_s10, %s128_s0 }
   0x5   :  { %p49_p2 = pnand %p47_p1, %p44_p0 }
   0x7   :  { %52 = shalt.err (!%p49_p2)
}
   0x8   :  { %s53_s15 = scalar_lea.vmem %s15_s7, 128  ;;  %p58_p4 = scmp.lt.s32.totalorder %s15_s7, %s15_s7 }
   0x9   :  { %p54_p3 = scmp.ne.s32.totalorder %s15_s7, %s53_s15  ;;  %p59_p5 = scmp.lt.s32.totalorder %s53_s15, %s53_s15 }
   0xb   :  { %p60_p6 = por %p59_p5, %p58_p4 }
   0xd   :  { %p61_p7 = pnand %p60_p6, %p54_p3 }
   0xf   :  { %64 = shalt.err (!%p61_p7)
}
  0x10   :  { %17 = dma.hbm_to_vmem [thread:$0]  %s128_s0, 128, %s15_s7, [#allocation3]  }
  0x11   :  { %87 = dma.done.wait [#allocation3], 128  }
  0x12   :  { %88 = vsyncadd [#allocation3], 4294967168  ;;  %v21_v0 = vld [vmem:[#allocation2] sm:$0xff]  ;;  %s92_s18 = smov 1   ;;  %s93_s19 = smov [#allocation5]  }
  0x13   :  { %22 = vrot.lane.b32.xlu0 %v21_v0, %s92_s18  ;;  %s31_s20 = sshll.u32 %s93_s19, 4  ;;  %s32_s20 = int_to_ptr.vmem [resolvable:$true] %s31_s20 }
  0x14   :  { %s65_s21 = scalar_lea.vmem %s32_s20, 128  ;;  %p70_p9 = scmp.lt.s32.totalorder %s32_s20, %s32_s20 }
  0x15   :  { %p66_p8 = scmp.ne.s32.totalorder %s32_s20, %s65_s21  ;;  %p71_p10 = scmp.lt.s32.totalorder %s65_s21, %s65_s21 }
  0x17   :  { %p72_p11 = por %p71_p10, %p70_p9 }
  0x19   :  { %p73_p12 = pnand %p72_p11, %p66_p8 }
  0x85   :  { %v23_v1 = vpop.permute.xlu0 %22 }
  0x86   :  { %24 = vst [vmem:[#allocation5] sm:$0xff] %v23_v1 }
  0x87   :  { %76 = shalt.err (!%p73_p12)
}
  0x88   :  { %s77_s0 = scalar_lea.hbm %s129_s1, 128 }
  0x89   :  { %p78_p13 = scmp.ne.s32.totalorder %s129_s1, %s77_s0  ;;  %p81_p0 = scmp.lt.u32.totalorder %s77_s0, %s129_s1 }
  0x8b   :  { %p83_p1 = pnand %p81_p0, %p78_p13 }
  0x8d   :  { %86 = shalt.err (!%p83_p1)
}
  0x8e   :  { %34 = dma.vmem_to_hbm [thread:$0]  %s32_s20, 128, %s129_s1, [#allocation4]  }
  0x8f   :  { %89 = dma.done.wait [#allocation4], 128  }
  0x90   :  { %90 = vsyncadd [#allocation4], 4294967168 }
  0x91   :  { %38 = vsyncpa [#allocation3], 1 }
  0x92   :  { %39 = vsyncpa [#allocation4], 1 }

</bundles_post_ra>
